<compile_context>
chip_gen: v7x
topology: tpu7x:2x2x1
jax: 0.10.0
libtpu: 0.0.40
codegen_flags: <defaults>
</compile_context>

<pallas_src>
import functools

import jax
import jax.numpy as jnp
from jax.experimental import pallas as pl
from jax.experimental.pallas import tpu as pltpu

FEATURE_SIZE = 255
H1 = 512
H2 = 16
NEG_SLOPE = 0.01     # nn.LeakyReLU() default


def _leaky_relu(x):
    return jnp.where(x > 0, x, NEG_SLOPE * x)


def _sigmoid(x):
    # Exact, stable, single EUP op: sigmoid(x) = 0.5 * (tanh(x/2) + 1).
    return 0.5 * (jnp.tanh(0.5 * x) + 1.0)


def d_mlp_kernel(x_ref, w1_ref, b1_ref, w2_ref, b2_ref, w3_ref, b3_ref, o_ref):
    # ---- Linear(255 -> 512): cast the f32 input tile to bf16 in-VMEM and run
    #      the dominant matmul on the MXU with f32 accumulation (K = 255 is
    #      masked internally by Mosaic). ----
    x_b = x_ref[...].astype(jnp.bfloat16)
    h = jnp.dot(x_b, w1_ref[...], preferred_element_type=jnp.float32)
    h = _leaky_relu(h + b1_ref[...])          # Dropout(0.3) == identity (eval)

    # ---- Linear(512 -> 16): bf16 operands as well, f32 accumulation ----
    h2 = jnp.dot(h.astype(jnp.bfloat16), w2_ref[...],
                 preferred_element_type=jnp.float32)
    h2 = _leaky_relu(h2 + b2_ref[...])

    # ---- Linear(16 -> 1): MXU-degenerate -> VPU multiply + lane reduction ----
    logit = jnp.sum(h2 * w3_ref[...], axis=-1, keepdims=True) + b3_ref[...]

    o_ref[...] = _sigmoid(logit).astype(o_ref.dtype)


def _round_up(n, m):
    return (n + m - 1) // m * m


def prepare_params(params):
    """One-time, kernel-ready parameter prep (casts / reshapes hoisted here)."""
    w1, b1, w2, b2, w3, b3 = params
    return (
        w1.astype(jnp.bfloat16),                       # [255, 512] bf16
        b1.reshape(1, H1).astype(jnp.float32),         # [1, 512]
        w2.astype(jnp.bfloat16),                       # [512, 16]  bf16
        b2.reshape(1, H2).astype(jnp.float32),         # [1, 16]
        w3.reshape(1, H2).astype(jnp.float32),         # [1, 16]  (VPU reduce)
        b3.reshape(1, 1).astype(jnp.float32),          # [1, 1]
    )


@functools.partial(jax.jit, static_argnames=("tb",))
def d_forward(x, prep_params, *, tb=2048):
    """x: [B, 255] float32 -> [B, 1] float32 (eval-mode forward)."""
    w1, b1, w2, b2, w3r, b3 = prep_params
    B = x.shape[0]

    # Batch tile: no bigger than the (sublane-rounded) batch, and small enough
    # that the grid has >= 2 steps when possible so the "parallel" batch axis
    # can span both v7x TensorCores. tb = 2048 keeps the working set
    # (double-buffered f32 x tile + f32/bf16 intermediates + resident weights)
    # ~14 MiB, well under the 48 MiB scoped-VMEM cap below on v5e/v6e/v7x.
    tb = min(int(tb), _round_up(B, 8), _round_up(pl.cdiv(B, 2), 8))

    grid = (pl.cdiv(B, tb),)   # partial edge block; OOB writes are dropped
    out = pl.pallas_call(
        d_mlp_kernel,
        out_shape=jax.ShapeDtypeStruct((B, 1), jnp.float32),
        grid=grid,
        in_specs=[
            pl.BlockSpec((tb, FEATURE_SIZE), lambda i: (i, 0)),   # x (f32, tiled)
            pl.BlockSpec((FEATURE_SIZE, H1), lambda i: (0, 0)),   # weights resident
            pl.BlockSpec((1, H1), lambda i: (0, 0)),
            pl.BlockSpec((H1, H2), lambda i: (0, 0)),
            pl.BlockSpec((1, H2), lambda i: (0, 0)),
            pl.BlockSpec((1, H2), lambda i: (0, 0)),
            pl.BlockSpec((1, 1), lambda i: (0, 0)),
        ],
        out_specs=pl.BlockSpec((tb, 1), lambda i: (i, 0)),
        compiler_params=pltpu.CompilerParams(
            dimension_semantics=("parallel",),
            vmem_limit_bytes=48 * 1024 * 1024,
        ),
    )(x, w1, b1, w2, b2, w3r, b3)

    return out


def init_params(key):
    """Deterministic init matching nn.Linear's default (U[-1/sqrt(fan_in), +])."""
    def linear(key, fan_in, fan_out):
        kw, kb = jax.random.split(key)
        bound = 1.0 / jnp.sqrt(float(fan_in))
        w = jax.random.uniform(kw, (fan_in, fan_out), jnp.float32, -bound, bound)
        b = jax.random.uniform(kb, (1, fan_out), jnp.float32, -bound, bound)
        return w, b

    k1, k2, k3 = jax.random.split(key, 3)
    w1, b1 = linear(k1, FEATURE_SIZE, H1)
    w2, b2 = linear(k2, H1, H2)
    w3, b3 = linear(k3, H2, 1)
    return (w1, b1, w2, b2, w3, b3)


def d_forward_ref(x, params):
    """Pure-JAX f32 reference for correctness check."""
    w1, b1, w2, b2, w3, b3 = params
    h = _leaky_relu(x @ w1 + b1)
    h = _leaky_relu(h @ w2 + b2)
    return jax.nn.sigmoid(h @ w3 + b3)


if __name__ == "__main__":
    key = jax.random.PRNGKey(0)
    kx, kp = jax.random.split(key)
    params = init_params(kp)
    prep = prepare_params(params)

    # Exercise both a tiny batch (single partial block) and a multi-block
    # batch with a partial edge block.
    for B in (4, 37):
        x = jax.random.normal(jax.random.fold_in(kx, B),
                              (B, FEATURE_SIZE), jnp.float32)
        out = jax.block_until_ready(d_forward(x, prep))
        ref = d_forward_ref(x, params)
        assert out.shape == (B, 1), out.shape
        # bf16 layer-1/2 operands -> loosened tolerance (error ~1e-3 in practice).
        assert jnp.allclose(out, ref, atol=2e-2, rtol=2e-2), (
            float(jnp.max(jnp.abs(out - ref))))

    print("KERNEL_OK")
</pallas_src>

<mosaic_0001>
module attributes {stable_mosaic.version = 11 : i64} {
  func.func @d_mlp_kernel(%arg0: i32, %arg1: memref<8x255xf32, #tpu.memory_space<vmem>>, %arg2: memref<255x512xbf16, #tpu.memory_space<vmem>>, %arg3: memref<1x512xf32, #tpu.memory_space<vmem>>, %arg4: memref<512x16xbf16, #tpu.memory_space<vmem>>, %arg5: memref<1x16xf32, #tpu.memory_space<vmem>>, %arg6: memref<1x16xf32, #tpu.memory_space<vmem>>, %arg7: memref<1x1xf32, #tpu.memory_space<vmem>>, %arg8: memref<8x1xf32, #tpu.memory_space<vmem>>) attributes {dimension_semantics = [#tpu.dimension_semantics<parallel>], iteration_bounds = array<i64: 1>, scalar_prefetch = 0 : i64, scratch_operands = 0 : i64, tpu.core_type = #tpu.core_type<tc>, window_params = [{transform_indices = @transform_0, window_bounds = array<i64: 8, 255>}, {pipeline_mode = #tpu.pipeline_mode<synchronous>, transform_indices = @transform_1, window_bounds = array<i64: 255, 512>}, {pipeline_mode = #tpu.pipeline_mode<synchronous>, transform_indices = @transform_2, window_bounds = array<i64: 1, 512>}, {pipeline_mode = #tpu.pipeline_mode<synchronous>, transform_indices = @transform_3, window_bounds = array<i64: 512, 16>}, {pipeline_mode = #tpu.pipeline_mode<synchronous>, transform_indices = @transform_4, window_bounds = array<i64: 1, 16>}, {pipeline_mode = #tpu.pipeline_mode<synchronous>, transform_indices = @transform_5, window_bounds = array<i64: 1, 16>}, {pipeline_mode = #tpu.pipeline_mode<synchronous>, transform_indices = @transform_6, window_bounds = array<i64: 1, 1>}, {transform_indices = @transform_7, window_bounds = array<i64: 8, 1>}]} {
    %c0 = arith.constant 0 : index
    %c0_0 = arith.constant 0 : index
    %0 = vector.load %arg1[%c0, %c0_0] : memref<8x255xf32, #tpu.memory_space<vmem>>, vector<8x255xf32>
    %1 = arith.truncf %0 : vector<8x255xf32> to vector<8x255xbf16>
    %c0_1 = arith.constant 0 : index
    %c0_2 = arith.constant 0 : index
    %2 = vector.load %arg2[%c0_1, %c0_2] : memref<255x512xbf16, #tpu.memory_space<vmem>>, vector<255x512xbf16>
    %cst = arith.constant dense<0.000000e+00> : vector<8x512xf32>
    %3 = tpu.matmul %1, %2, %cst {dimension_numbers = #tpu.dot_dimension_numbers<[1], [0], [0], [1], [0, 0, 1, 1], [], []>} : vector<8x255xbf16>, vector<255x512xbf16>, vector<8x512xf32> -> vector<8x512xf32>
    %c0_3 = arith.constant 0 : index
    %c0_4 = arith.constant 0 : index
    %4 = vector.load %arg3[%c0_3, %c0_4] : memref<1x512xf32, #tpu.memory_space<vmem>>, vector<1x512xf32>
    %5 = vector.broadcast %4 : vector<1x512xf32> to vector<8x512xf32>
    %6 = arith.addf %3, %5 : vector<8x512xf32>
    %cst_5 = arith.constant 0.000000e+00 : f32
    %7 = vector.broadcast %cst_5 : f32 to vector<8x512xf32>
    %8 = arith.cmpf ogt, %6, %7 : vector<8x512xf32>
    %cst_6 = arith.constant 0.00999999977 : f32
    %9 = vector.broadcast %cst_6 : f32 to vector<8x512xf32>
    %10 = arith.mulf %9, %6 : vector<8x512xf32>
    %11 = arith.select %8, %6, %10 : vector<8x512xi1>, vector<8x512xf32>
    %12 = arith.truncf %11 : vector<8x512xf32> to vector<8x512xbf16>
    %c0_7 = arith.constant 0 : index
    %c0_8 = arith.constant 0 : index
    %13 = vector.load %arg4[%c0_7, %c0_8] : memref<512x16xbf16, #tpu.memory_space<vmem>>, vector<512x16xbf16>
    %cst_9 = arith.constant dense<0.000000e+00> : vector<8x16xf32>
    %14 = tpu.matmul %12, %13, %cst_9 {dimension_numbers = #tpu.dot_dimension_numbers<[1], [0], [0], [1], [0, 0, 1, 1], [], []>} : vector<8x512xbf16>, vector<512x16xbf16>, vector<8x16xf32> -> vector<8x16xf32>
    %c0_10 = arith.constant 0 : index
    %c0_11 = arith.constant 0 : index
    %15 = vector.load %arg5[%c0_10, %c0_11] : memref<1x16xf32, #tpu.memory_space<vmem>>, vector<1x16xf32>
    %16 = vector.broadcast %15 : vector<1x16xf32> to vector<8x16xf32>
    %17 = arith.addf %14, %16 : vector<8x16xf32>
    %cst_12 = arith.constant 0.000000e+00 : f32
    %18 = vector.broadcast %cst_12 : f32 to vector<8x16xf32>
    %19 = arith.cmpf ogt, %17, %18 : vector<8x16xf32>
    %cst_13 = arith.constant 0.00999999977 : f32
    %20 = vector.broadcast %cst_13 : f32 to vector<8x16xf32>
    %21 = arith.mulf %20, %17 : vector<8x16xf32>
    %22 = arith.select %19, %17, %21 : vector<8x16xi1>, vector<8x16xf32>
    %c0_14 = arith.constant 0 : index
    %c0_15 = arith.constant 0 : index
    %23 = vector.load %arg6[%c0_14, %c0_15] : memref<1x16xf32, #tpu.memory_space<vmem>>, vector<1x16xf32>
    %24 = vector.broadcast %23 : vector<1x16xf32> to vector<8x16xf32>
    %25 = arith.mulf %22, %24 : vector<8x16xf32>
    %cst_16 = arith.constant dense<0.000000e+00> : vector<8xf32>
    %26 = vector.multi_reduction <add>, %25, %cst_16 [1] : vector<8x16xf32> to vector<8xf32>
    %27 = vector.shape_cast %26 : vector<8xf32> to vector<8x1xf32>
    %c0_17 = arith.constant 0 : index
    %c0_18 = arith.constant 0 : index
    %28 = vector.load %arg7[%c0_17, %c0_18] : memref<1x1xf32, #tpu.memory_space<vmem>>, vector<1x1xf32>
    %29 = vector.broadcast %28 : vector<1x1xf32> to vector<8x1xf32>
    %30 = arith.addf %27, %29 : vector<8x1xf32>
    %cst_19 = arith.constant 5.000000e-01 : f32
    %31 = vector.broadcast %cst_19 : f32 to vector<8x1xf32>
    %32 = arith.mulf %31, %30 : vector<8x1xf32>
    %33 = math.tanh %32 : vector<8x1xf32>
    %cst_20 = arith.constant 1.000000e+00 : f32
    %34 = vector.broadcast %cst_20 : f32 to vector<8x1xf32>
    %35 = arith.addf %33, %34 : vector<8x1xf32>
    %cst_21 = arith.constant 5.000000e-01 : f32
    %36 = vector.broadcast %cst_21 : f32 to vector<8x1xf32>
    %37 = arith.mulf %36, %35 : vector<8x1xf32>
    %c0_22 = arith.constant 0 : index
    %c0_23 = arith.constant 0 : index
    %38 = vector.load %arg8[%c0_22, %c0_23] : memref<8x1xf32, #tpu.memory_space<vmem>>, vector<8x1xf32>
    tpu.vector_store %arg8[%c0_22, %c0_23], %37 {strides = array<i32>} : memref<8x1xf32, #tpu.memory_space<vmem>>, vector<8x1xf32>,
    return
  }
  func.func @transform_0(%arg0: i32) -> (i32, i32) {
    %c0_i32 = arith.constant 0 : i32
    %c0_i32_0 = arith.constant 0 : i32
    return %arg0, %c0_i32 : i32, i32
  }
  func.func @transform_1(%arg0: i32) -> (i32, i32) {
    %c0_i32 = arith.constant 0 : i32
    %c0_i32_0 = arith.constant 0 : i32
    %c0_i32_1 = arith.constant 0 : i32
    return %c0_i32, %c0_i32_0 : i32, i32
  }
  func.func @transform_2(%arg0: i32) -> (i32, i32) {
    %c0_i32 = arith.constant 0 : i32
    %c0_i32_0 = arith.constant 0 : i32
    %c0_i32_1 = arith.constant 0 : i32
    return %c0_i32, %c0_i32_0 : i32, i32
  }
  func.func @transform_3(%arg0: i32) -> (i32, i32) {
    %c0_i32 = arith.constant 0 : i32
    %c0_i32_0 = arith.constant 0 : i32
    %c0_i32_1 = arith.constant 0 : i32
    return %c0_i32, %c0_i32_0 : i32, i32
  }
  func.func @transform_4(%arg0: i32) -> (i32, i32) {
    %c0_i32 = arith.constant 0 : i32
    %c0_i32_0 = arith.constant 0 : i32
    %c0_i32_1 = arith.constant 0 : i32
    return %c0_i32, %c0_i32_0 : i32, i32
  }
  func.func @transform_5(%arg0: i32) -> (i32, i32) {
    %c0_i32 = arith.constant 0 : i32
    %c0_i32_0 = arith.constant 0 : i32
    %c0_i32_1 = arith.constant 0 : i32
    return %c0_i32, %c0_i32_0 : i32, i32
  }
  func.func @transform_6(%arg0: i32) -> (i32, i32) {
    %c0_i32 = arith.constant 0 : i32
    %c0_i32_0 = arith.constant 0 : i32
    %c0_i32_1 = arith.constant 0 : i32
    return %c0_i32, %c0_i32_0 : i32, i32
  }
  func.func @transform_7(%arg0: i32) -> (i32, i32) {
    %c0_i32 = arith.constant 0 : i32
    %c0_i32_0 = arith.constant 0 : i32
    return %arg0, %c0_i32 : i32, i32
  }
}

</mosaic_0001>

<bundles_post_ra>
// kernel: d_forward.1
= control target key start
LH: loop header
LB: loop body
LE: loop exit
PB: predicated region body
PF: predicated region fallthrough
CT: control target
= control target key end

     0   :  { %s1464_s0 = inlined_call_operand.vmem [shape: f32[4,255], index: 0, kind: input, shape index: {}]   ;;  %s1465_s1 = inlined_call_operand.hbm [shape: bf16[255,512], index: 1, kind: input, shape index: {}]   ;;  %s1466_s2 = inlined_call_operand.vmem [shape: f32[1,512], index: 2, kind: input, shape index: {}]   ;;  %s1467_s3 = inlined_call_operand.vmem [shape: bf16[512,16], index: 3, kind: input, shape index: {}]   ;;  %s1468_s4 = inlined_call_operand.vmem [shape: f32[1,16], index: 4, kind: input, shape index: {}]   ;;  %s1469_s5 = inlined_call_operand.vmem [shape: f32[1,16], index: 5, kind: input, shape index: {}]   ;;  %s1470_s6 = inlined_call_operand.<no memory space> [shape: f32[1,1], index: 6, kind: input, shape index: {}]   ;;  %s1471_s7 = inlined_call_operand.vmem [shape: f32[4,1], index: 7, kind: output, shape index: {}]  }
   0x1   :  { %v12_v0 = vstv %s1470_s6 }
   0x2   :  { %13 = vst [vmem:[#allocation2] sm:$0x1] %v12_v0 }
   0x3   :  { %14 = vsyncpa [#allocation4], 0  ;;  %s1291_s26 = smov [#allocation3]   ;;  %s1267_s30 = scalar_lea.hbm %s1465_s1, 8192 }
   0x4   :  { %s22_s27 = sshll.u32 %s1291_s26, 4  ;;  %p1268_p0 = scmp.ne.s32.totalorder %s1465_s1, %s1267_s30  ;;  %s23_s27 = int_to_ptr.vmem [resolvable:$true] %s22_s27 }
   0x5   :  { %p1271_p1 = scmp.lt.u32.totalorder %s1267_s30, %s1465_s1 }
   0x7   :  { %p1273_p2 = pnand %p1271_p1, %p1268_p0 }
   0x9   :  { %1276 = shalt.err (!%p1273_p2)
}
   0xa   :  { %s1277_s6 = scalar_lea.vmem %s23_s27, 8192  ;;  %p1282_p4 = scmp.lt.s32.totalorder %s23_s27, %s23_s27 }
   0xb   :  { %p1278_p3 = scmp.ne.s32.totalorder %s23_s27, %s1277_s6  ;;  %p1283_p5 = scmp.lt.s32.totalorder %s1277_s6, %s1277_s6 }
   0xd   :  { %p1284_p6 = por %p1283_p5, %p1282_p4 }
   0xf   :  { %p1285_p7 = pnand %p1284_p6, %p1278_p3 }
  0x11   :  { %1288 = shalt.err (!%p1285_p7)
}
  0x12   :  { %s1292_s12 = smov 256   ;;  %s1293_s13 = smov 16  }
  0x13   :  { %28 = dma.hbm_to_vmem [thread:$0]  %s1465_s1, 8192, %s23_s27, [#allocation4], %s1292_s12, %s1292_s12, %s1293_s13  }
  0x14   :  { %1289 = dma.done.wait [#allocation4], 8192  }
  0x15   :  { %1290 = vsyncadd [#allocation4], 4294959104  ;;  %v1134_v1 = vld [vmem:[#allocation3 + $0x4] ss:$16 sps:$4 sm:$0xff]   ;;  %v1136_v2 = vld [vmem:[#allocation3 + $0xc] ss:$16 sps:$4 sm:$0xff]  }
  0x16   :  { %475 = vmatprep.subr.bf16.mxu0 %v1134_v1  ;;  %v1138_v3 = vld [vmem:[#allocation3] ss:$16 sps:$4 sm:$0xff]   ;;  %v1139_v4 = vld [vmem:[#allocation3 + $0x8] ss:$16 sps:$4 sm:$0xff]   ;;  %516 = vmatprep.subr.bf16.mxu1 %v1136_v2  ;;  %v1140_v5 = vld [vmem:[#allocation3 + $0x24] ss:$16 sps:$4 sm:$0xff]  }
  0x17   :  { %476 = vmatpush1.bf16.msra.mxu0 %v1138_v3  ;;  %517 = vmatpush1.bf16.msra.mxu1 %v1139_v4  ;;  %v1142_v6 = vld [vmem:[#allocation3 + $0x2c] ss:$16 sps:$4 sm:$0xff]   ;;  %v1144_v7 = vld [vmem:[#allocation3 + $0x20] ss:$16 sps:$4 sm:$0xff]   ;;  %v1145_v8 = vld [vmem:[#allocation3 + $0x28] ss:$16 sps:$4 sm:$0xff]  }
  0x18   :  { %477 = vmatprep.subr.bf16.mxu0 %v1140_v5  ;;  %518 = vmatprep.subr.bf16.mxu1 %v1142_v6  ;;  %v1146_v9 = vld [vmem:[#allocation3 + $0x44] ss:$16 sps:$4 sm:$0xff]   ;;  %v1148_v10 = vld [vmem:[#allocation3 + $0x4c] ss:$16 sps:$4 sm:$0xff]   ;;  %v1150_v11 = vld [vmem:[#allocation3 + $0x40] ss:$16 sps:$4 sm:$0xff]  }
  0x19   :  { %v1151_v12 = vld [vmem:[#allocation3 + $0x48] ss:$16 sps:$4 sm:$0xff]   ;;  %v1152_v13 = vld [vmem:[#allocation3 + $0x64] ss:$16 sps:$4 sm:$0xff]   ;;  %v1154_v14 = vld [vmem:[#allocation3 + $0x6c] ss:$16 sps:$4 sm:$0xff]  }
  0x1a   :  { %v1156_v15 = vld [vmem:[#allocation3 + $0x60] ss:$16 sps:$4 sm:$0xff]   ;;  %v1157_v16 = vld [vmem:[#allocation3 + $0x68] ss:$16 sps:$4 sm:$0xff]   ;;  %v1158_v17 = vld [vmem:[#allocation3 + $0x84] ss:$16 sps:$4 sm:$0xff]  }
  0x1b   :  { %478 = vmatpush1.bf16.msra.mxu0 %v1144_v7  ;;  %519 = vmatpush1.bf16.msra.mxu1 %v1145_v8  ;;  %v1160_v18 = vld [vmem:[#allocation3 + $0x8c] ss:$16 sps:$4 sm:$0xff]   ;;  %v1162_v19 = vld [vmem:[#allocation3 + $0x80] ss:$16 sps:$4 sm:$0xff]   ;;  %v1163_v20 = vld [vmem:[#allocation3 + $0x88] ss:$16 sps:$4 sm:$0xff]  }
  0x1c   :  { %479 = vmatprep.subr.bf16.mxu0 %v1146_v9  ;;  %520 = vmatprep.subr.bf16.mxu1 %v1148_v10  ;;  %v1164_v21 = vld [vmem:[#allocation3 + $0xa4] ss:$16 sps:$4 sm:$0xff]   ;;  %v1166_v22 = vld [vmem:[#allocation3 + $0xac] ss:$16 sps:$4 sm:$0xff]   ;;  %v1168_v23 = vld [vmem:[#allocation3 + $0xa0] ss:$16 sps:$4 sm:$0xff]  }
  0x1d   :  { %v1169_v24 = vld [vmem:[#allocation3 + $0xa8] ss:$16 sps:$4 sm:$0xff]   ;;  %v1170_v25 = vld [vmem:[#allocation3 + $0xc4] ss:$16 sps:$4 sm:$0xff]   ;;  %v1172_v26 = vld [vmem:[#allocation3 + $0xcc] ss:$16 sps:$4 sm:$0xff]  }
  0x1e   :  { %v1174_v27 = vld [vmem:[#allocation3 + $0xc0] ss:$16 sps:$4 sm:$0xff]   ;;  %v1175_v28 = vld [vmem:[#allocation3 + $0xc8] ss:$16 sps:$4 sm:$0xff]   ;;  %v1176_v29 = vld [vmem:[#allocation3 + $0xe4] ss:$16 sps:$4 sm:$0xff]  }
  0x1f   :  { %480 = vmatpush1.bf16.msra.mxu0 %v1150_v11  ;;  %521 = vmatpush1.bf16.msra.mxu1 %v1151_v12  ;;  %v1178_v30 = vld [vmem:[#allocation3 + $0xec] ss:$16 sps:$4 sm:$0xff]   ;;  %v1180_v31 = vld [vmem:[#allocation3 + $0xe0] ss:$16 sps:$4 sm:$0xff]   ;;  %v1181_v32 = vld [vmem:[#allocation3 + $0xe8] ss:$16 sps:$4 sm:$0xff]  }
  0x20   :  { %481 = vmatprep.subr.bf16.mxu0 %v1152_v13  ;;  %522 = vmatprep.subr.bf16.mxu1 %v1154_v14  ;;  %v1182_v33 = vld [vmem:[#allocation3 + $0x104] ss:$16 sps:$4 sm:$0xff]   ;;  %v1184_v34 = vld [vmem:[#allocation3 + $0x10c] ss:$16 sps:$4 sm:$0xff]   ;;  %v1186_v35 = vld [vmem:[#allocation3 + $0x100] ss:$16 sps:$4 sm:$0xff]  }
  0x21   :  { %v1187_v36 = vld [vmem:[#allocation3 + $0x108] ss:$16 sps:$4 sm:$0xff]   ;;  %v1188_v37 = vld [vmem:[#allocation3 + $0x124] ss:$16 sps:$4 sm:$0xff]   ;;  %v1190_v38 = vld [vmem:[#allocation3 + $0x12c] ss:$16 sps:$4 sm:$0xff]  }
  0x22   :  { %v1192_v39 = vld [vmem:[#allocation3 + $0x120] ss:$16 sps:$4 sm:$0xff]   ;;  %v1193_v40 = vld [vmem:[#allocation3 + $0x128] ss:$16 sps:$4 sm:$0xff]   ;;  %v1194_v41 = vld [vmem:[#allocation3 + $0x144] ss:$16 sps:$4 sm:$0xff]  }
  0x23   :  { %482 = vmatpush1.bf16.msra.mxu0 %v1156_v15  ;;  %523 = vmatpush1.bf16.msra.mxu1 %v1157_v16  ;;  %v1196_v42 = vld [vmem:[#allocation3 + $0x14c] ss:$16 sps:$4 sm:$0xff]   ;;  %vm459_vm0 = vcmask 1046528   ;;  %v1198_v43 = vld [vmem:[#allocation3 + $0x140] ss:$16 sps:$4 sm:$0xff]   ;;  %vm460_vm1 = vcmask 1047552  }
  0x24   :  { %483 = vmatprep.subr.bf16.mxu0 %v1158_v17  ;;  %524 = vmatprep.subr.bf16.mxu1 %v1160_v18  ;;  %v1199_v44 = vld [vmem:[#allocation3 + $0x148] ss:$16 sps:$4 sm:$0xff]   ;;  %v1200_v45 = vld [vmem:[#allocation3 + $0x164] ss:$16 sps:$4 sm:$0xff]   ;;  %v1294_v46 = vmov 65535   ;;  %vm455_vm2 = vcmask 1039360  }
  0x25   :  { %v461_v47 = vsel %vm459_vm0, 4294967295, %v1294_v46  ;;  %v1202_v48 = vld [vmem:[#allocation3 + $0x16c] ss:$16 sps:$4 sm:$0xff]   ;;  %v1204_v49 = vld [vmem:[#allocation3 + $0x160] ss:$16 sps:$4 sm:$0xff]   ;;  %vm927_vm8 = vcmask 130048  }
  0x26   :  { %v1205_v50 = vld [vmem:[#allocation3 + $0x168] ss:$16 sps:$4 sm:$0xff]   ;;  %v462_v51 = vsel %vm460_vm1, %v461_v47, 0  ;;  %v1206_v53 = vld [vmem:[#allocation3 + $0x184] ss:$16 sps:$4 sm:$0xff]   ;;  %vm943_vm9 = vcmask 7168  }
  0x27   :  { %484 = vmatpush1.bf16.msra.mxu0 %v1162_v19  ;;  %525 = vmatpush1.bf16.msra.mxu1 %v1163_v20  ;;  %v1232_v52 = vld [vmem:[%s1464_s0 + $0x4] ss:$8 sps:$4 sm:$0xff]   ;;  %v1230_v8 = vld [vmem:[%s1464_s0] ss:$8 sps:$4 sm:$0xff]   ;;  %v1241_v20 = vld [vmem:[%s1467_s3 + $0x50] sm:$0xff]  }
  0x28   :  { %485 = vmatprep.subr.bf16.mxu0 %v1164_v21  ;;  %526 = vmatprep.subr.bf16.mxu1 %v1166_v22  ;;  %v1208_v54 = vld [vmem:[#allocation3 + $0x18c] ss:$16 sps:$4 sm:$0xff]   ;;  %v52_v55 = vpack.c.bf16 %v1232_v52, %v1232_v52  ;;  %v1210_v56 = vld [vmem:[#allocation3 + $0x180] ss:$16 sps:$4 sm:$0xff]   ;;  %v1211_v57 = vld [vmem:[#allocation3 + $0x188] ss:$16 sps:$4 sm:$0xff]   ;;  %v51_v14 = vpack.c.bf16 %v1230_v8, %v1230_v8 }
  0x29   :  { %v1212_v58 = vld [vmem:[#allocation3 + $0x1a4] ss:$16 sps:$4 sm:$0xff]   ;;  %v1214_v59 = vld [vmem:[#allocation3 + $0x1ac] ss:$16 sps:$4 sm:$0xff]   ;;  %v1216_v60 = vld [vmem:[#allocation3 + $0x1a0] ss:$16 sps:$4 sm:$0xff]  }
  0x2a   :  { %1049 = vmatprep.mubr.msk.bf16.mxu0 %vm455_vm2, %v52_v55  ;;  %1050 = vmatprep.mubr.msk.bf16.mxu1 %vm455_vm2, %v52_v55  ;;  %v1217_v61 = vld [vmem:[#allocation3 + $0x1a8] ss:$16 sps:$4 sm:$0xff]   ;;  %v1218_v62 = vld [vmem:[#allocation3 + $0x1c4] ss:$16 sps:$4 sm:$0xff]   ;;  %v1220_v63 = vld [vmem:[#allocation3 + $0x1cc] ss:$16 sps:$4 sm:$0xff]  }
  0x2b   :  { %486 = vmatpush1.bf16.msra.mxu0 %v1168_v23  ;;  %527 = vmatpush1.bf16.msra.mxu1 %v1169_v24  ;;  %v1224_v0 = vld [vmem:[#allocation3 + $0x1e4] ss:$16 sps:$4 sm:$0xff]   ;;  %v1226_v1 = vld [vmem:[#allocation3 + $0x1ec] ss:$16 sps:$4 sm:$0xff]   ;;  %v1222_v2 = vld [vmem:[#allocation3 + $0x1c0] ss:$16 sps:$4 sm:$0xff]  }
  0x2c   :  { %487 = vmatprep.subr.bf16.mxu0 %v1170_v25  ;;  %528 = vmatprep.subr.bf16.mxu1 %v1172_v26  ;;  %v1223_v3 = vld [vmem:[#allocation3 + $0x1c8] ss:$16 sps:$4 sm:$0xff]   ;;  %v1228_v4 = vld [vmem:[#allocation3 + $0x1e0] ss:$16 sps:$4 sm:$0xff]   ;;  %v467_v6 = vand.u32 %v1224_v0, %v462_v51  ;;  %v473_v7 = vand.u32 %v1226_v1, %v462_v51 }
  0x2d   :  { %v1229_v5 = vld [vmem:[#allocation3 + $0x1e8] ss:$16 sps:$4 sm:$0xff]   ;;  %v464_v9 = vand.u32 %v1228_v4, %v462_v51  ;;  %v1233_v11 = vld [vmem:[%s1467_s3 + $0x40] sm:$0xff]   ;;  %v1242_v21 = vld [vmem:[%s1467_s3 + $0xd0] sm:$0xff]  }
  0x2e   :  { %v470_v10 = vand.u32 %v1229_v5, %v462_v51  ;;  %v1234_v12 = vld [vmem:[%s1467_s3 + $0xc0] sm:$0xff]   ;;  %v1237_v16 = vld [vmem:[%s1467_s3 + $0x48] sm:$0xff]   ;;  %v1243_v22 = vld [vmem:[%s1467_s3 + $0x10] sm:$0xff]  }
  0x2f   :  { %488 = vmatpush1.bf16.msra.mxu0 %v1174_v27  ;;  %529 = vmatpush1.bf16.msra.mxu1 %v1175_v28  ;;  %v1235_v13 = vld [vmem:[%s1467_s3] sm:$0xff]   ;;  %v1238_v17 = vld [vmem:[%s1467_s3 + $0xc8] sm:$0xff]   ;;  %v1244_v23 = vld [vmem:[%s1467_s3 + $0x90] sm:$0xff]  }
  0x30   :  { %489 = vmatprep.subr.bf16.mxu0 %v1176_v29  ;;  %530 = vmatprep.subr.bf16.mxu1 %v1178_v30  ;;  %v1236_v15 = vld [vmem:[%s1467_s3 + $0x80] sm:$0xff]   ;;  %v1239_v18 = vld [vmem:[%s1467_s3 + $0x8] sm:$0xff]   ;;  %v1245_v24 = vld [vmem:[%s1467_s3 + $0x58] sm:$0xff]  }
  0x31   :  { %v1240_v19 = vld [vmem:[%s1467_s3 + $0x88] sm:$0xff]   ;;  %v1246_v25 = vld [vmem:[%s1467_s3 + $0xd8] sm:$0xff]   ;;  %v1249_v28 = vld [vmem:[%s1467_s3 + $0x60] sm:$0xff]  }
  0x32   :  { %v1247_v26 = vld [vmem:[%s1467_s3 + $0x18] sm:$0xff]   ;;  %v1250_v29 = vld [vmem:[%s1467_s3 + $0xe0] sm:$0xff]  }
  0x33   :  { %490 = vmatpush1.bf16.msra.mxu0 %v1180_v31  ;;  %531 = vmatpush1.bf16.msra.mxu1 %v1181_v32  ;;  %v1248_v27 = vld [vmem:[%s1467_s3 + $0x98] sm:$0xff]   ;;  %v1251_v30 = vld [vmem:[%s1467_s3 + $0x20] sm:$0xff]   ;;  %v1253_v32 = vld [vmem:[%s1467_s3 + $0x68] sm:$0xff]  }
  0x34   :  { %491 = vmatprep.subr.bf16.mxu0 %v1182_v33  ;;  %532 = vmatprep.subr.bf16.mxu1 %v1184_v34  ;;  %v1252_v31 = vld [vmem:[%s1467_s3 + $0xa0] sm:$0xff]   ;;  %v1254_v33 = vld [vmem:[%s1467_s3 + $0xe8] sm:$0xff]  }
  0x35   :  { %v1255_v34 = vld [vmem:[%s1467_s3 + $0x28] sm:$0xff]  }
  0x37   :  { %492 = vmatpush1.bf16.msra.mxu0 %v1186_v35  ;;  %533 = vmatpush1.bf16.msra.mxu1 %v1187_v36  ;;  %v1256_v35 = vld [vmem:[%s1467_s3 + $0xa8] sm:$0xff]   ;;  %v1257_v36 = vld [vmem:[%s1467_s3 + $0x70] sm:$0xff]  }
  0x38   :  { %493 = vmatprep.subr.bf16.mxu0 %v1188_v37  ;;  %534 = vmatprep.subr.bf16.mxu1 %v1190_v38  ;;  %v1258_v37 = vld [vmem:[%s1467_s3 + $0xf0] sm:$0xff]  }
  0x39   :  { %v1259_v38 = vld [vmem:[%s1467_s3 + $0x30] sm:$0xff]  }
  0x3b   :  { %494 = vmatpush1.bf16.msra.mxu0 %v1192_v39  ;;  %535 = vmatpush1.bf16.msra.mxu1 %v1193_v40  ;;  %v1260_v39 = vld [vmem:[%s1467_s3 + $0xb0] sm:$0xff]   ;;  %v1261_v40 = vld [vmem:[%s1467_s3 + $0x78] sm:$0xff]  }
  0x3c   :  { %495 = vmatprep.subr.bf16.mxu0 %v1194_v41  ;;  %536 = vmatprep.subr.bf16.mxu1 %v1196_v42  ;;  %v1262_v41 = vld [vmem:[%s1467_s3 + $0xf8] sm:$0xff]  }
  0x3d   :  { %v1263_v42 = vld [vmem:[%s1467_s3 + $0x38] sm:$0xff]  }
  0x3f   :  { %496 = vmatpush1.bf16.msra.mxu0 %v1198_v43  ;;  %537 = vmatpush1.bf16.msra.mxu1 %v1199_v44  ;;  %v1264_v43 = vld [vmem:[%s1467_s3 + $0xb8] sm:$0xff]   ;;  %v119_v44 = vlaneseq }
  0x40   :  { %497 = vmatprep.subr.bf16.mxu0 %v1200_v45  ;;  %538 = vmatprep.subr.bf16.mxu1 %v1202_v48  ;;  %v117_v48 = vld [vmem:[%s1466_s2] sm:$0xf] }
  0x41   :  { %v120_v45 = vshrl.u32 %v119_v44, 7 }
  0x43   :  { %498 = vmatpush1.bf16.msra.mxu0 %v1204_v49  ;;  %539 = vmatpush1.bf16.msra.mxu1 %v1205_v50  ;;  %v121_v46 = vsub.s32 0, %v120_v45  ;;  %v129_v47 = vsub.s32 2, %v120_v45  ;;  %v125_v49 = vsub.s32 1, %v120_v45  ;;  %v133_v50 = vsub.s32 3, %v120_v45 }
  0x44   :  { %499 = vmatprep.subr.bf16.mxu0 %v1206_v53  ;;  %540 = vmatprep.subr.bf16.mxu1 %v1208_v54 }
  0x45   :  { %v122_v51 = vrot.slane %v117_v48, %v121_v46  ;;  %v130_v52 = vrot.slane %v117_v48, %v129_v47  ;;  %v126_v53 = vrot.slane %v117_v48, %v125_v49  ;;  %v134_v54 = vrot.slane %v117_v48, %v133_v50 }
  0x47   :  { %500 = vmatpush1.bf16.msra.mxu0 %v1210_v56  ;;  %541 = vmatpush1.bf16.msra.mxu1 %v1211_v57 }
  0x48   :  { %501 = vmatprep.subr.bf16.mxu0 %v1212_v58  ;;  %542 = vmatprep.subr.bf16.mxu1 %v1214_v59 }
  0x4b   :  { %502 = vmatpush1.bf16.msra.mxu0 %v1216_v60  ;;  %543 = vmatpush1.bf16.msra.mxu1 %v1217_v61 }
  0x4c   :  { %503 = vmatprep.subr.bf16.mxu0 %v1218_v62  ;;  %544 = vmatprep.subr.bf16.mxu1 %v1220_v63 }
  0x4f   :  { %504 = vmatpush1.bf16.msra.mxu0 %v1222_v2  ;;  %545 = vmatpush1.bf16.msra.mxu1 %v1223_v3 }
  0x50   :  { %505 = vmatprep.subr.bf16.mxu0 %v467_v6  ;;  %546 = vmatprep.subr.bf16.mxu1 %v473_v7 }
  0x53   :  { %506 = vmatpush1.bf16.msra.mxu0 %v464_v9  ;;  %547 = vmatpush1.bf16.msra.mxu1 %v470_v10 }
  0x54   :  { %1086 = vmatprep.subr.bf16.mxu0 %v1233_v11  ;;  %1108 = vmatprep.subr.bf16.mxu1 %v1234_v12 }
  0x56   :  { %508 = vmatmul.mubr.bf16.vlgmr.msra.gmra.mrb[0].mxu0 %v51_v14  ;;  %549 = vmatmul.mubr.bf16.vlgmr.msra.gmra.mrb[0].mxu1 %v51_v14 }
  0x57   :  { %1087 = vmatpush3.bf16.msra.mxu0 %v1235_v13  ;;  %1109 = vmatpush3.bf16.msra.mxu1 %v1236_v15 }
  0x58   :  { %1088 = vmatprep.subr.bf16.mxu0 %v1237_v16  ;;  %1110 = vmatprep.subr.bf16.mxu1 %v1238_v17  ;;  %v1051_v17 = vld [vmem:[%s1468_s4] ss:$0 sm:$0xff] }
  0x5b   :  { %1089 = vmatpush3.bf16.msra.mxu0 %v1239_v18  ;;  %1111 = vmatpush3.bf16.msra.mxu1 %v1240_v19 }
  0x5c   :  { %1090 = vmatprep.subr.bf16.mxu0 %v1241_v20  ;;  %1112 = vmatprep.subr.bf16.mxu1 %v1242_v21 }
  0x5f   :  { %1091 = vmatpush3.bf16.msra.mxu0 %v1243_v22  ;;  %1113 = vmatpush3.bf16.msra.mxu1 %v1244_v23 }
  0x60   :  { %1092 = vmatprep.subr.bf16.mxu0 %v1245_v24  ;;  %1114 = vmatprep.subr.bf16.mxu1 %v1246_v25 }
  0x63   :  { %1093 = vmatpush3.bf16.msra.mxu0 %v1247_v26  ;;  %1115 = vmatpush3.bf16.msra.mxu1 %v1248_v27 }
  0x64   :  { %1094 = vmatprep.subr.bf16.mxu0 %v1249_v28  ;;  %1116 = vmatprep.subr.bf16.mxu1 %v1250_v29  ;;  %v1084_v29 = vld [vmem:[%s1469_s5] ss:$0 sm:$0xff] }
  0x67   :  { %1095 = vmatpush3.bf16.msra.mxu0 %v1251_v30  ;;  %1117 = vmatpush3.bf16.msra.mxu1 %v1252_v31 }
  0x68   :  { %1096 = vmatprep.subr.bf16.mxu0 %v1253_v32  ;;  %1118 = vmatprep.subr.bf16.mxu1 %v1254_v33  ;;  %v1085_v33 = vld [vmem:[#allocation2] ss:$0 sm:$0xff] }
  0x6b   :  { %1097 = vmatpush3.bf16.msra.mxu0 %v1255_v34  ;;  %1119 = vmatpush3.bf16.msra.mxu1 %v1256_v35 }
  0x6c   :  { %1098 = vmatprep.subr.bf16.mxu0 %v1257_v36  ;;  %1120 = vmatprep.subr.bf16.mxu1 %v1258_v37 }
  0x6f   :  { %1099 = vmatpush3.bf16.msra.mxu0 %v1259_v38  ;;  %1121 = vmatpush3.bf16.msra.mxu1 %v1260_v39 }
  0x70   :  { %1100 = vmatprep.subr.bf16.mxu0 %v1261_v40  ;;  %1122 = vmatprep.subr.bf16.mxu1 %v1262_v41 }
  0x73   :  { %1101 = vmatpush3.bf16.msra.mxu0 %v1263_v42  ;;  %1123 = vmatpush3.bf16.msra.mxu1 %v1264_v43 }
 0x129   :  { %v509_v55 = vpop.f32.mrb[0].mxu0  ;;  %v550_v56 = vpop.f32.mrb[0].mxu1 }
 0x12a   :  { %v510_v57 = vadd.f32 %v509_v55, %v122_v51  ;;  %v551_v58 = vadd.f32 %v550_v56, %v130_v52  ;;  %v511_v59 = vpop.f32.mrb[1].mxu0  ;;  %v552_v60 = vpop.f32.mrb[1].mxu1 }
 0x12b   :  { %v512_v61 = vadd.f32 %v511_v59, %v126_v53  ;;  %v553_v62 = vadd.f32 %v552_v60, %v134_v54  ;;  %v513_v63 = vpop.f32.mrb[2].mxu0  ;;  %v554_v0 = vpop.f32.mrb[2].mxu1 }
 0x12c   :  { %vm557_vm3 = vcmp.gt.f32.partialorder %v510_v57, 0.0  ;;  %v561_v1 = vmul.f32 0.01, %v510_v57  ;;  %vm559_vm4 = vcmp.gt.f32.partialorder %v551_v58, 0.0  ;;  %v563_v2 = vmul.f32 0.01, %v551_v58 }
 0x12d   :  { %vm558_vm5 = vcmp.gt.f32.partialorder %v512_v61, 0.0  ;;  %v562_v3 = vmul.f32 0.01, %v512_v61  ;;  %vm560_vm6 = vcmp.gt.f32.partialorder %v553_v62, 0.0  ;;  %v564_v4 = vmul.f32 0.01, %v553_v62 }
 0x12e   :  { %v565_v5 = vsel %vm557_vm3, %v510_v57, %v561_v1  ;;  %v567_v6 = vsel %vm559_vm4, %v551_v58, %v563_v2  ;;  %v514_v7 = vpop.f32.mrb[3].mxu0  ;;  %v555_v8 = vpop.f32.mrb[3].mxu1 }
 0x12f   :  { %v566_v9 = vsel %vm558_vm5, %v512_v61, %v562_v3  ;;  %v568_v10 = vsel %vm560_vm6, %v553_v62, %v564_v4  ;;  %v569_v13 = vpack.c.bf16 %v565_v5, %v565_v5  ;;  %v571_v14 = vpack.c.bf16 %v567_v6, %v567_v6 }
 0x130   :  { %v570_v11 = vpack.c.bf16 %v566_v9, %v566_v9  ;;  %v572_v12 = vpack.c.bf16 %v568_v10, %v568_v10 }
 0x132   :  { %868 = vmatprep.mubr.bf16.mxu0 %v570_v11  ;;  %908 = vmatprep.mubr.bf16.mxu1 %v572_v12 }
 0x133   :  { %869 = vmatmul.mubr.bf16.vlgmr.msra.gmra.mrb[4].mxu0 %v569_v13  ;;  %909 = vmatmul.mubr.bf16.vlgmr.msra.gmra.mrb[4].mxu1 %v571_v14 }
 0x206   :  { %v1102_v15 = vpop.f32.mrb[4].mxu0  ;;  %v1124_v16 = vpop.f32.mrb[4].mxu1 }
 0x207   :  { %v1103_v18 = vpop.f32.mrb[5].mxu0  ;;  %v1125_v19 = vpop.f32.mrb[5].mxu1 }
 0x208   :  { %v1104_v20 = vadd.f32 %v1103_v18, %v1102_v15  ;;  %v1126_v21 = vadd.f32 %v1125_v19, %v1124_v16  ;;  %v1105_v22 = vpop.f32.mrb[6].mxu0  ;;  %v1127_v23 = vpop.f32.mrb[6].mxu1 }
 0x209   :  { %v1106_v24 = vpop.f32.mrb[7].mxu0  ;;  %v1128_v25 = vpop.f32.mrb[7].mxu1 }
 0x20a   :  { %v871_v26 = vadd.f32 %v1104_v20, %v1051_v17 }
 0x20c   :  { %v911_v27 = vadd.f32 %v1126_v21, %v871_v26 }
 0x20e   :  { %v917_v28 = vmul.f32 0.01, %v911_v27  ;;  %vm916_vm7 = vcmp.gt.f32.partialorder %v911_v27, 0.0 }
 0x210   :  { %v918_v30 = vsel %vm916_vm7, %v911_v27, %v917_v28 }
 0x211   :  { %v926_v31 = vmul.f32 %v1084_v29, %v918_v30 }
 0x213   :  { %v928_v32 = vsel %vm927_vm8, %v926_v31, 0.0 }
 0x214   :  { %929 = vadd.xlane.f32.xlu0 %v928_v32 }
 0x2a1   :  { %v930_v34 = vpop.xlane.xlu0 %929 }
 0x2a2   :  { %v938_v35 = vadd.f32 %v1085_v33, %v930_v34 }
 0x2a4   :  { %v939_v36 = vmul.f32 0.5, %v938_v35 }
 0x2a6   :  { %1265 = vtanh.f32 %v939_v36 }
 0x2b0   :  { %v1266_v37 = vpop.eup %1265 }
 0x2b1   :  { %v941_v38 = vadd.f32 1.0, %v1266_v37 }
 0x2b3   :  { %v942_v39 = vmul.f32 0.5, %v941_v38 }
 0x2b5   :  { %944 = vst.msk [vmem:[#allocation5] sm:$0xff] %vm943_vm9, %v942_v39 }
 0x2bc   :  { %v962_v40 = vld [vmem:[#allocation5] sm:$0xf] }
 0x2bd   :  { %963 = vst [vmem:[%s1471_s7] sm:$0xf] %v962_v40 }
 0x2be   :  { %980 = vsyncpa [#allocation4], 1 }

</bundles_post_ra>
